<compile_context>
chip_gen: v6e
topology: v6e:2x2x1
jax: 0.10.0
libtpu: 0.0.40
codegen_flags: <defaults>
</compile_context>

<pallas_src>
import math

import jax
import jax.numpy as jnp
from jax import lax
from jax.experimental import pallas as pl
from jax.experimental.pallas import tpu as pltpu


# layout: everything 2D row-major; last dim maps to TPU lanes.
#   matrix : (S, S) float32
#   preds  : (B, S) float32
#   gts    : (B, 1) int32     (class indices, not one-hot)
#   output : (1, 1) float32 scalar loss in SMEM
def graph_matrix_loss_kernel(mat_ref, preds_ref, gts_ref, out_ref):
    S = mat_ref.shape[0]
    B = preds_ref.shape[0]

    # Upper-triangular mask built in-kernel (iota + compare on the VPU; no HBM DMA).
    row = lax.broadcasted_iota(jnp.int32, (S, S), 0)
    col = lax.broadcasted_iota(jnp.int32, (S, S), 1)
    m = jnp.where(row <= col, mat_ref[...], 0.0)

    # Symmetrize, then numerically-stable softmax over dim 0 (columns sum to 1).
    m = (m + m.T) * 0.5
    m = m - jnp.max(m, axis=0, keepdims=True)
    e = jnp.exp(m)
    m = e / jnp.sum(e, axis=0, keepdims=True)

    # One-hot(gts) built in-kernel from the (B,1) int32 index vector.
    cls = lax.broadcasted_iota(jnp.int32, (B, S), 1)
    onehot = (cls == gts_ref[...]).astype(preds_ref.dtype)

    # Single fused MXU matmul for both projections: [preds; one_hot] @ M.
    stacked = jnp.concatenate([preds_ref[...], onehot], axis=0)    # (2B, S)
    pg = jnp.dot(stacked, m, preferred_element_type=jnp.float32)   # (2B, S)
    p = pg[:B]
    g = pg[B:]

    # Focal-style term with explicit square (exact, VPU-only).
    t = 1.0 - p * g
    out_ref[0, 0] = jnp.sum(t * t) * (1.0 / B)


def init_graph_matrix(key, size):
    """Deterministic init matching GraphMatrix.__init__."""
    mask = jnp.triu(jnp.ones((size, size), jnp.float32), k=0)
    std = math.sqrt(2.0 / size / size)
    param = 1.0 + std * jax.random.normal(key, (size, size), dtype=jnp.float32)
    param = jnp.where(mask < 1.0, 0.0, param)  # param[mask < 1] = 0
    return param, mask


def graph_matrix_forward(matrix, preds, gts_idx):
    """Everything (masking, softmax, one-hot, matmul, reduction) runs in-kernel."""
    B, S = preds.shape
    gts2d = gts_idx.astype(jnp.int32).reshape(B, 1)
    out = pl.pallas_call(
        graph_matrix_loss_kernel,
        out_shape=jax.ShapeDtypeStruct((1, 1), jnp.float32),
        # No grid: single invocation, whole (tiny) arrays in VMEM, no double-buffering.
        in_specs=[
            pl.BlockSpec(memory_space=pltpu.MemorySpace.VMEM),  # matrix (S,S)
            pl.BlockSpec(memory_space=pltpu.MemorySpace.VMEM),  # preds  (B,S)
            pl.BlockSpec(memory_space=pltpu.MemorySpace.VMEM),  # gts    (B,1) int32
        ],
        out_specs=pl.BlockSpec(memory_space=pltpu.MemorySpace.SMEM),  # scalar loss
        compiler_params=pltpu.CompilerParams(vmem_limit_bytes=16 * 1024 * 1024),
    )(matrix, preds, gts2d)
    return out[0, 0]


if __name__ == "__main__":
    key = jax.random.PRNGKey(0)
    k_param, k_preds, k_gts = jax.random.split(key, 3)

    S = 32   # graph size / num classes
    B = 8    # batch

    matrix, mask = init_graph_matrix(k_param, S)
    preds = jax.nn.softmax(jax.random.normal(k_preds, (B, S), jnp.float32), axis=-1)
    gts = jax.random.randint(k_gts, (B,), 0, S)

    loss = graph_matrix_forward(matrix, preds, gts)
    loss = jax.block_until_ready(loss)

    # Pure-JAX reference check (same math as the PyTorch forward).
    m_ref = matrix * mask
    m_ref = (m_ref + m_ref.T) / 2.0
    m_ref = jax.nn.softmax(m_ref, axis=0)
    p_ref = preds @ m_ref
    g_ref = jax.nn.one_hot(gts, S, dtype=jnp.float32) @ m_ref
    ref = jnp.mean(jnp.sum((1.0 - p_ref * g_ref) ** 2, axis=-1))
    assert jnp.allclose(loss, ref, rtol=1e-5, atol=1e-6), (float(loss), float(ref))

    print("KERNEL_OK")
</pallas_src>

<mosaic_0001>
module attributes {stable_mosaic.version = 11 : i64} {
  func.func @graph_matrix_loss_kernel(%arg0: memref<32x32xf32, #tpu.memory_space<vmem>>, %arg1: memref<8x32xf32, #tpu.memory_space<vmem>>, %arg2: memref<8x1xi32, #tpu.memory_space<vmem>>, %arg3: memref<1x1xf32, #tpu.memory_space<smem>>) attributes {dimension_semantics = [], scalar_prefetch = 0 : i64, scratch_operands = 0 : i64, tpu.core_type = #tpu.core_type<tc>} {
    %0 = tpu.iota {dimensions = array<i32: 0>} : vector<32x32xi32>
    %1 = tpu.iota {dimensions = array<i32: 1>} : vector<32x32xi32>
    %2 = arith.cmpi sle, %0, %1 : vector<32x32xi32>
    %c0 = arith.constant 0 : index
    %c0_0 = arith.constant 0 : index
    %3 = vector.load %arg0[%c0, %c0_0] : memref<32x32xf32, #tpu.memory_space<vmem>>, vector<32x32xf32>
    %cst = arith.constant 0.000000e+00 : f32
    %4 = vector.broadcast %cst : f32 to vector<32x32xf32>
    %5 = arith.select %2, %3, %4 : vector<32x32xi1>, vector<32x32xf32>
    %6 = tpu.transpose %5, [1, 0] : vector<32x32xf32> -> vector<32x32xf32>
    %7 = arith.addf %5, %6 : vector<32x32xf32>
    %cst_1 = arith.constant 5.000000e-01 : f32
    %8 = vector.broadcast %cst_1 : f32 to vector<32x32xf32>
    %9 = arith.mulf %7, %8 : vector<32x32xf32>
    %cst_2 = arith.constant dense<0xFF800000> : vector<32xf32>
    %10 = vector.multi_reduction <maximumf>, %9, %cst_2 [0] : vector<32x32xf32> to vector<32xf32>
    %11 = vector.shape_cast %10 : vector<32xf32> to vector<1x32xf32>
    %12 = vector.broadcast %11 : vector<1x32xf32> to vector<32x32xf32>
    %13 = arith.subf %9, %12 : vector<32x32xf32>
    %14 = math.exp %13 : vector<32x32xf32>
    %cst_3 = arith.constant dense<0.000000e+00> : vector<32xf32>
    %15 = vector.multi_reduction <add>, %14, %cst_3 [0] : vector<32x32xf32> to vector<32xf32>
    %16 = vector.shape_cast %15 : vector<32xf32> to vector<1x32xf32>
    %17 = vector.broadcast %16 : vector<1x32xf32> to vector<32x32xf32>
    %18 = arith.divf %14, %17 : vector<32x32xf32>
    %19 = tpu.iota {dimensions = array<i32: 1>} : vector<8x32xi32>
    %c0_4 = arith.constant 0 : index
    %c0_5 = arith.constant 0 : index
    %20 = vector.load %arg2[%c0_4, %c0_5] : memref<8x1xi32, #tpu.memory_space<vmem>>, vector<8x1xi32>
    %21 = vector.broadcast %20 : vector<8x1xi32> to vector<8x32xi32>
    %22 = arith.cmpi eq, %19, %21 : vector<8x32xi32>
    %23 = arith.extui %22 : vector<8x32xi1> to vector<8x32xi32>
    %24 = arith.sitofp %23 : vector<8x32xi32> to vector<8x32xf32>
    %c0_6 = arith.constant 0 : index
    %c0_7 = arith.constant 0 : index
    %25 = vector.load %arg1[%c0_6, %c0_7] : memref<8x32xf32, #tpu.memory_space<vmem>>, vector<8x32xf32>
    %26 = tpu.concatenate %25, %24 in 0 : vector<8x32xf32>, vector<8x32xf32> -> vector<16x32xf32>
    %cst_8 = arith.constant dense<0.000000e+00> : vector<16x32xf32>
    %27 = tpu.matmul %26, %18, %cst_8 {dimension_numbers = #tpu.dot_dimension_numbers<[1], [0], [0], [1], [0, 0, 1, 1], [], []>} : vector<16x32xf32>, vector<32x32xf32>, vector<16x32xf32> -> vector<16x32xf32>
    %28 = vector.extract_strided_slice %27 {offsets = [0, 0], sizes = [8, 32], strides = [1, 1]} : vector<16x32xf32> to vector<8x32xf32>
    %29 = vector.extract_strided_slice %27 {offsets = [8, 0], sizes = [8, 32], strides = [1, 1]} : vector<16x32xf32> to vector<8x32xf32>
    %30 = arith.mulf %28, %29 : vector<8x32xf32>
    %cst_9 = arith.constant 1.000000e+00 : f32
    %31 = vector.broadcast %cst_9 : f32 to vector<8x32xf32>
    %32 = arith.subf %31, %30 : vector<8x32xf32>
    %33 = arith.mulf %32, %32 : vector<8x32xf32>
    %34 = vector.shape_cast %33 : vector<8x32xf32> to vector<1x8x32xf32>
    %cst_10 = arith.constant dense<0.000000e+00> : vector<1xf32>
    %35 = vector.multi_reduction <add>, %34, %cst_10 [1, 2] : vector<1x8x32xf32> to vector<1xf32>
    %36 = vector.shape_cast %35 : vector<1xf32> to vector<1x1x1xf32>
    %37 = vector.extract %36[0, 0, 0] : f32 from vector<1x1x1xf32>
    %cst_11 = arith.constant 1.250000e-01 : f32
    %38 = arith.mulf %37, %cst_11 : f32
    %c0_12 = arith.constant 0 : index
    %c0_13 = arith.constant 0 : index
    %39 = memref.load %arg3[%c0_12, %c0_13] : memref<1x1xf32, #tpu.memory_space<smem>>
    memref.store %38, %arg3[%c0_12, %c0_13] : memref<1x1xf32, #tpu.memory_space<smem>>
    return
  }
}

</mosaic_0001>

<bundles_post_ra>
// kernel: tpu_custom_call.1
= control target key start
LH: loop header
LB: loop body
LE: loop exit
PB: predicated region body
PF: predicated region fallthrough
CT: control target
= control target key end

     0   :  { %8 = vsyncpa [#allocation3], 0  ;;  %s379_s0 = inlined_call_operand.hbm [shape: f32[32,32], index: 0, kind: input, shape index: {}]   ;;  %s380_s1 = inlined_call_operand.vmem [shape: f32[8,32], index: 1, kind: input, shape index: {}]   ;;  %s381_s2 = inlined_call_operand.vmem [shape: s32[8,1], index: 2, kind: input, shape index: {}]   ;;  %s382_s3 = inlined_call_operand.hbm [shape: f32[1,1], index: 3, kind: output, shape index: {}]  }
   0x1   :  { %9 = vsyncpa [#allocation4], 0  ;;  %s323_s12 = smov [#allocation2]  }
   0x2   :  { %s15_s13 = sshll.u32 %s323_s12, 4  ;;  %s16_s13 = int_to_ptr.vmem [resolvable:$true] %s15_s13 }
   0x3   :  { %s299_s14 = scalar_lea.vmem %s16_s13, 512  ;;  %p304_p1 = scmp.lt.s32.totalorder %s16_s13, %s16_s13 }
   0x4   :  { %p300_p0 = scmp.ne.s32.totalorder %s16_s13, %s299_s14  ;;  %p305_p2 = scmp.lt.s32.totalorder %s299_s14, %s299_s14 }
   0x6   :  { %p306_p3 = por %p305_p2, %p304_p1 }
   0x8   :  { %p307_p4 = pnand %p306_p3, %p300_p0 }
   0xa   :  { %310 = shalt.err (!%p307_p4)
}
   0xb   :  { %s324_s15 = smov 128   ;;  %s325_s16 = smov 8  }
   0xc   :  { %21 = dma.hbm_to_vmem [thread:$0]  %s379_s0, 512, %s16_s13, [#allocation3], %s324_s15, %s324_s15, %s325_s16  }
   0xd   :  { %319 = dma.done.wait [#allocation3], 512  }
   0xe   :  { %320 = vsyncadd [#allocation3], 4294966784  ;;  %v29_v0 = vlaneseq  ;;  %v326_v1 = vmov 0   ;;  %v40_v5 = vld [vmem:[#allocation2] sm:$0xff]  ;;  %v41_v6 = vld [vmem:[#allocation2 + $0x8] sm:$0xff]  ;;  %vm88_vm4 = vcmask 261120  }
   0xf   :  { %279 = vset.pattern.permute.xlu1 %v326_v1  ;;  %v132_v9 = vld [vmem:[%s381_s2] sm:$0xff]  ;;  %v42_v11 = vld [vmem:[#allocation2 + $0x10] sm:$0xff]  ;;  %v43_v14 = vld [vmem:[#allocation2 + $0x18] sm:$0xff]  ;;  %s328_s22 = smov [#allocation5]  }
  0x10   :  { %v30_v2 = vshrl.u32 %v29_v0, 7  ;;  %v352_v3 = vand.u32 127, %v29_v0  ;;  %134 = vperm.xlu1 %279, %v132_v9   ;;  %v139_v16 = vld [vmem:[%s380_s1] sm:$0xff] }
  0x11   :  { %268 = vmatprep.mubr.msk.f32.mxu0 %vm88_vm4, %v139_v16 }
  0x12   :  { %v31_v4 = vadd.s32 8, %v30_v2  ;;  %vm36_vm0 = vcmp.le.s32.totalorder %v30_v2, %v352_v3  ;;  %v32_v7 = vadd.s32 16, %v30_v2  ;;  %v33_v12 = vadd.s32 24, %v30_v2 }
  0x13   :  { %v44_v8 = vsel %vm36_vm0, %v40_v5, 0.0 }
  0x14   :  { %vm37_vm1 = vcmp.le.s32.totalorder %v31_v4, %v352_v3  ;;  %48 = vxpose.xlu0.b32.start [1/4] (short) (narrow) %v44_v8, 32  ;;  %vm38_vm2 = vcmp.le.s32.totalorder %v32_v7, %v352_v3  ;;  %vm39_vm3 = vcmp.le.s32.totalorder %v33_v12, %v352_v3 }
  0x15   :  { %v45_v10 = vsel %vm37_vm1, %v41_v6, 0.0  ;;  %v46_v13 = vsel %vm38_vm2, %v42_v11, 0.0  ;;  %v47_v15 = vsel %vm39_vm3, %v43_v14, 0.0 }
  0x18   :  { %49 = vxpose.xlu0.b32.cont [2/4] (short) (narrow) %v45_v10, 32 }
  0x1c   :  { %50 = vxpose.xlu0.b32.cont [3/4] (short) (narrow) %v46_v13, 32 }
  0x20   :  { %51 = vxpose.xlu0.b32.end [4/4] (short) (narrow) %v47_v15, 32 }
  0x49   :  { %280 = vset.pattern.permute.xlu0 %v326_v1 }
  0x8b   :  { %v135_v6 = vpop.permute.xlu1 %134 }
  0x8c   :  { %vm136_vm5 = vcmp.eq.s32.totalorder %v352_v3, %v135_v6 }
  0x90   :  { %v64_v17 = vpop.trf.xlu0 }
  0x91   :  { %v80_v21 = vadd.f32 %v64_v17, %v44_v8 }
  0x93   :  { %v84_v25 = vmul.f32 0.5, %v80_v21 }
  0x94   :  { %v65_v18 = vpop.trf.xlu0 }
  0x95   :  { %v81_v19 = vadd.f32 %v65_v18, %v45_v10  ;;  %v89_v30 = vsel %vm88_vm4, %v84_v25, -inf  ;;  %v327_v10 = vmov 0.0  }
  0x96   :  { %v251_v11 = vsel %vm136_vm5, 1.0, %v327_v10 }
  0x97   :  { %v85_v23 = vmul.f32 0.5, %v81_v19 }
  0x98   :  { %v66_v20 = vpop.trf.xlu0 }
  0x99   :  { %v82_v22 = vadd.f32 %v66_v20, %v46_v13  ;;  %v90_v28 = vsel %vm88_vm4, %v85_v23, -inf }
  0x9a   :  { %v93_v33 = vmax.f32 %v89_v30, %v90_v28 }
  0x9b   :  { %v86_v26 = vmul.f32 0.5, %v82_v22 }
  0x9c   :  { %v67_v24 = vpop.trf.xlu0 }
  0x9d   :  { %v83_v27 = vadd.f32 %v67_v24, %v47_v15  ;;  %v91_v31 = vsel %vm88_vm4, %v86_v26, -inf }
  0x9f   :  { %v87_v29 = vmul.f32 0.5, %v83_v27 }
  0xa1   :  { %v92_v32 = vsel %vm88_vm4, %v87_v29, -inf }
  0xa2   :  { %v94_v34 = vmax.f32 %v91_v31, %v92_v32 }
  0xa4   :  { %v95_v35 = vmax.f32 %v93_v33, %v94_v34 }
  0xa6   :  { %v96_v36 = vrot.slane %v95_v35, 4 }
  0xa8   :  { %v97_v37 = vmax.f32 %v95_v35, %v96_v36 }
  0xaa   :  { %v98_v38 = vrot.slane %v97_v37, 2 }
  0xac   :  { %v99_v39 = vmax.f32 %v97_v37, %v98_v38 }
  0xae   :  { %v100_v40 = vrot.slane %v99_v39, 1 }
  0xb0   :  { %v101_v41 = vmax.f32 %v99_v39, %v100_v40 }
  0xb2   :  { %v102_v42 = vsub.f32 %v84_v25, %v101_v41  ;;  %v103_v43 = vsub.f32 %v85_v23, %v101_v41  ;;  %v104_v44 = vsub.f32 %v86_v26, %v101_v41  ;;  %v105_v45 = vsub.f32 %v87_v29, %v101_v41 }
  0xb4   :  { %v106_v46 = vmul.f32 1.442695, %v102_v42  ;;  %v108_v47 = vmul.f32 1.442695, %v103_v43  ;;  %v110_v48 = vmul.f32 1.442695, %v104_v44 }
  0xb5   :  { %v112_v49 = vmul.f32 1.442695, %v105_v45 }
  0xb6   :  { %281 = vpow2.f32 %v106_v46 }
  0xb7   :  { %283 = vpow2.f32 %v108_v47 }
  0xb8   :  { %285 = vpow2.f32 %v110_v48 }
  0xb9   :  { %287 = vpow2.f32 %v112_v49 }
  0xc3   :  { %v282_v50 = vpop.eup %281 }
  0xc4   :  { %v284_v51 = vpop.eup %283  ;;  %v114_v52 = vsel %vm88_vm4, %v282_v50, 0.0 }
  0xc5   :  { %v286_v53 = vpop.eup %285  ;;  %v115_v54 = vsel %vm88_vm4, %v284_v51, 0.0 }
  0xc6   :  { %v288_v55 = vpop.eup %287  ;;  %v116_v56 = vadd.f32 %v115_v54, %v114_v52  ;;  %v117_v57 = vsel %vm88_vm4, %v286_v53, 0.0 }
  0xc7   :  { %v119_v59 = vsel %vm88_vm4, %v288_v55, 0.0 }
  0xc8   :  { %v118_v58 = vadd.f32 %v117_v57, %v116_v56 }
  0xca   :  { %v120_v60 = vadd.f32 %v119_v59, %v118_v58 }
  0xcc   :  { %v121_v61 = vrot.slane %v120_v60, 4 }
  0xce   :  { %v122_v62 = vadd.f32 %v121_v61, %v120_v60 }
  0xd0   :  { %v123_v63 = vrot.slane %v122_v62, 2 }
  0xd2   :  { %v124_v0 = vadd.f32 %v123_v63, %v122_v62 }
  0xd4   :  { %v125_v1 = vrot.slane %v124_v0, 1 }
  0xd6   :  { %v126_v2 = vadd.f32 %v125_v1, %v124_v0 }
  0xd8   :  { %289 = vrcp.f32 %v126_v2 }
  0xe5   :  { %v290_v4 = vpop.eup %289 }
  0xe6   :  { %v131_v5 = vmul.f32 %v290_v4, %v288_v55  ;;  %v130_v7 = vmul.f32 %v290_v4, %v286_v53  ;;  %v129_v8 = vmul.f32 %v290_v4, %v284_v51  ;;  %v128_v9 = vmul.f32 %v290_v4, %v282_v50 }
  0xe8   :  { %260 = vmatprep.subr.mxu0 %v131_v5 }
  0xe9   :  { %261 = vmatpush3.msra.mxu0 %v131_v5 }
  0xea   :  { %262 = vmatprep.subr.mxu0 %v130_v7 }
  0xeb   :  { %263 = vmatpush3.msra.mxu0 %v130_v7 }
  0xec   :  { %264 = vmatprep.subr.mxu0 %v129_v8 }
  0xed   :  { %265 = vmatpush3.msra.mxu0 %v129_v8 }
  0xee   :  { %266 = vmatprep.subr.mxu0 %v128_v9 }
  0xef   :  { %267 = vmatpush3.msra.mxu0 %v128_v9 }
  0xf0   :  { %269 = vmatmul.mubr.msk.f32.vlgmr.msra.gmra.mxu0 %vm88_vm4, %v251_v11 }
 0x1b0   :  { %v270_v12 = vpop.f32.mrf.mxu0 }
 0x1b2   :  { %v212_v13 = vpop.f32.mrf.mxu0 }
 0x1b3   :  { %v221_v14 = vmul.f32 %v270_v12, %v212_v13 }
 0x1b5   :  { %v222_v15 = vsub.f32 1.0, %v221_v14 }
 0x1b7   :  { %v223_v16 = vmul.f32 %v222_v15, %v222_v15 }
 0x1b9   :  { %v224_v17 = vsel %vm88_vm4, %v223_v16, 0.0 }
 0x1ba   :  { %225 = vadd.xlane.f32.xlu1 %v224_v17 }
 0x243   :  { %v226_v18 = vpop.xlane.xlu1 %225 }
 0x244   :  { %v227_v3 = vrot.slane %v226_v18, 4 }
 0x246   :  { %v228_v19 = vadd.f32 %v227_v3, %v226_v18 }
 0x248   :  { %v229_v20 = vrot.slane %v228_v19, 2 }
 0x24a   :  { %v230_v21 = vadd.f32 %v229_v20, %v228_v19 }
 0x24c   :  { %v231_v22 = vrot.slane %v230_v21, 1 }
 0x24e   :  { %v232_v23 = vadd.f32 %v231_v22, %v230_v21 }
 0x250   :  { %271 = vpush %v232_v23 }
 0x281   :  { %s272_s1 = spop %271 }
 0x282   :  { %s234_s2 = smul.f32 0.125, %s272_s1 }
 0x284   :  { %236 = sst [smem:[#allocation5]] %s234_s2 }
 0x285   :  { %244 = dma.smem_to_hbm %s328_s22, 16, %s382_s3, [#allocation4]  }
 0x286   :  { %321 = dma.done.wait [#allocation4], 16  }
 0x287   :  { %322 = vsyncadd [#allocation4], 4294967280 }
 0x288   :  { %248 = sfence }
 0x289   :  { %249 = vsyncpa [#allocation3], 1 }
 0x28a   :  { %250 = vsyncpa [#allocation4], 1 }

</bundles_post_ra>
